<compile_context>
chip_gen: v7x
topology: tpu7x:2x2x1
jax: 0.10.0
libtpu: 0.0.40
codegen_flags: <defaults>
</compile_context>

<pallas_src>
import jax
import jax.numpy as jnp
from jax.experimental import pallas as pl
from jax.experimental.pallas import tpu as pltpu

PADDING_SETTING = (1, 2, 1, 2)  # (l, r, t, b) -> H cropped by (l, r), W by (t, b)

# Per-grid-step VMEM budget (input tile + output tile, each double-buffered by
# the pipeline).  Conservative: leaves plenty of headroom on v7x (64 MiB VMEM).
_TILE_BUDGET_BYTES = 8 << 20


def _pad_up(a, m):
    return -(-a // m) * m


def _choose_cb(nc, h, w, ho, wo, itemsize, budget=_TILE_BUDGET_BYTES):
    """Largest divisor of nc whose padded, double-buffered tiles fit the budget.

    Prefers a divisor that leaves >= 2 grid steps so the parallel grid axis can
    be split across v7x's 2 TensorCores.
    """
    per_plane = (
        _pad_up(h, 8) * _pad_up(w, 128) + _pad_up(ho, 8) * _pad_up(wo, 128)
    ) * itemsize * 2  # x2: double-buffered by the auto-pipeline

    divisors = [d for d in range(1, nc + 1) if nc % d == 0]
    fits = [d for d in divisors if d * per_plane <= budget] or [1]
    multi = [d for d in fits if nc // d >= 2]
    return max(multi) if multi else max(fits)


def _make_crop_kernel(h0, w0, ho, wo):
    """Static-slice crop: o = x[:, h0:h0+ho, w0:w0+wo] on the VMEM tile."""

    def kernel(x_ref, o_ref):
        o_ref[...] = x_ref[:, h0:h0 + ho, w0:w0 + wo]

    return kernel


def u_transposed_pad(x, padding_setting=PADDING_SETTING):
    """Pallas implementation of UTransposedPad.forward (NCHW layout)."""
    l, r, t, b = padding_setting
    assert r > 0 and b > 0, "negative-index slice semantics require r, b > 0"
    N, C, H, W = x.shape
    Ho = H - l - r
    Wo = W - t - b
    assert Ho > 0 and Wo > 0, "crop must leave a positive spatial extent"

    nc = N * C
    # Contiguous NCHW -> (N*C, H, W) is a metadata-only reshape.
    x_flat = x.reshape(nc, H, W)

    cb = _choose_cb(nc, H, W, Ho, Wo, x.dtype.itemsize)
    grid = (nc // cb,)

    out = pl.pallas_call(
        _make_crop_kernel(l, t, Ho, Wo),
        out_shape=jax.ShapeDtypeStruct((nc, Ho, Wo), x.dtype),
        grid_spec=pltpu.PrefetchScalarGridSpec(
            num_scalar_prefetch=0,
            grid=grid,
            # Blocks cover the full (H, W) / (Ho, Wo) extents -> satisfies the
            # (8, 128) block-shape rule even for odd crop sizes.
            in_specs=[pl.BlockSpec((cb, H, W), lambda g: (g, 0, 0))],
            out_specs=pl.BlockSpec((cb, Ho, Wo), lambda g: (g, 0, 0)),
        ),
        compiler_params=pltpu.CompilerParams(
            dimension_semantics=("parallel",),   # megacore-shardable on v7x
            vmem_limit_bytes=64 << 20,
        ),
    )(x_flat)

    return out.reshape(N, C, Ho, Wo)


if __name__ == "__main__":
    key = jax.random.PRNGKey(0)
    N, C, H, W = 2, 4, 16, 16
    x = jax.random.normal(key, (N, C, H, W), dtype=jnp.float32)

    out = u_transposed_pad(x)
    out = jax.block_until_ready(out)

    # Reference: identical slicing to the PyTorch module.
    l, r, t, b = PADDING_SETTING
    ref = x[:, :, l:-r, t:-b]
    assert out.shape == ref.shape, (out.shape, ref.shape)
    assert bool(jnp.array_equal(out, ref)), "Pallas crop mismatch vs reference"

    print("KERNEL_OK")
</pallas_src>

<mosaic_0001>
module attributes {stable_mosaic.version = 11 : i64} {
  func.func @kernel(%arg0: i32, %arg1: memref<4x16x16xf32, #tpu.memory_space<vmem>>, %arg2: memref<4x13x13xf32, #tpu.memory_space<vmem>>) attributes {dimension_semantics = [#tpu.dimension_semantics<parallel>], iteration_bounds = array<i64: 2>, scalar_prefetch = 0 : i64, scratch_operands = 0 : i64, tpu.core_type = #tpu.core_type<tc>, window_params = [{transform_indices = @transform_0, window_bounds = array<i64: 4, 16, 16>}, {transform_indices = @transform_1, window_bounds = array<i64: 4, 13, 13>}]} {
    %c0 = arith.constant 0 : index
    %c1 = arith.constant 1 : index
    %c1_0 = arith.constant 1 : index
    %0 = vector.load %arg1[%c0, %c1, %c1_0] : memref<4x16x16xf32, #tpu.memory_space<vmem>>, vector<4x13x13xf32>
    %c0_1 = arith.constant 0 : index
    %c0_2 = arith.constant 0 : index
    %c0_3 = arith.constant 0 : index
    %1 = vector.load %arg2[%c0_1, %c0_2, %c0_3] : memref<4x13x13xf32, #tpu.memory_space<vmem>>, vector<4x13x13xf32>
    tpu.vector_store %arg2[%c0_1, %c0_2, %c0_3], %0 {strides = array<i32>} : memref<4x13x13xf32, #tpu.memory_space<vmem>>, vector<4x13x13xf32>,
    return
  }
  func.func @transform_0(%arg0: i32) -> (i32, i32, i32) {
    %c0_i32 = arith.constant 0 : i32
    %c0_i32_0 = arith.constant 0 : i32
    %c0_i32_1 = arith.constant 0 : i32
    return %arg0, %c0_i32, %c0_i32_0 : i32, i32, i32
  }
  func.func @transform_1(%arg0: i32) -> (i32, i32, i32) {
    %c0_i32 = arith.constant 0 : i32
    %c0_i32_0 = arith.constant 0 : i32
    %c0_i32_1 = arith.constant 0 : i32
    return %arg0, %c0_i32, %c0_i32_0 : i32, i32, i32
  }
}

</mosaic_0001>

<bundles_post_ra>
// kernel: tpu_custom_call.1
= control target key start
LH: loop header
LB: loop body
LE: loop exit
PB: predicated region body
PF: predicated region fallthrough
CT: control target
= control target key end

     0   :  { %6 = vsyncpa [#allocation3], 0  ;;  %s628_s0 = inlined_call_operand.hbm [shape: f32[8,16,16], index: 0, kind: input, shape index: {}]   ;;  %s629_s1 = inlined_call_operand.hbm [shape: f32[8,13,13], index: 1, kind: output, shape index: {}]  }
   0x1   :  { %8 = vsyncpa [#allocation3 + $0x1], 0 }
   0x2   :  { %9 = vsyncpa [#allocation4], 0 }
   0x3   :  { %11 = vsyncpa [#allocation4 + $0x1], 0  ;;  %s462_s6 = smov 0   ;;  %s464_s7 = smov 0  }
   0x4   :  { %s466_s8 = smov 0   ;;  %s468_s9 = smov 0  }
   0x5 LB: > { %s483_s10 = sadd.s32 4294967295, %s443_s9   ;;  %s276_s11 = sadd.s32 4294967294, %s443_s9   ;;  %s443_s9 = sphi %s468_s9, %s642_s9   ;;  %s439_s8 = sphi %s466_s8, %s641_s8   ;;  %s435_s7 = sphi %s464_s7, %s640_s7   ;;  %s431_s6 = sphi %s462_s6, %s639_s6  }
   0x6   : > { %s487_s12 = sadd.s32 1, %s443_s9   ;;  %s24_s13 = sadd.s32 1, %s439_s8 }
   0x7   : > { %s21_s14 = ssub.s32 %s443_s9, %s487_s12  ;;  %p31_p0 = scmp.ne.s32.totalorder %s439_s8, %s435_s7 }
   0x8   : > { %p22_p1 = scmp.eq.s32.totalorder %s21_s14, 0  ;;  %p32_p2 = scmp.eq.s32.totalorder %s443_s9, 0 }
   0x9   : > { %p37_p3 = scmp.ne.s32.totalorder %s435_s7, %s431_s6  ;;  %p38_p4 = scmp.eq.s32.totalorder %s483_s10, 0 }
   0xa   : > { %s499_s15 = scalar_select %p22_p1, %s439_s8, %s24_s13  }
   0xb   : > { %p501_p5 = por %p32_p2, %p31_p0  ;;  %p505_p6 = por %p38_p4, %p37_p3 }
   0xc   : > { %p61_p7 = scmp.eq.s32.totalorder %s483_s10, 1  ;;  %p67_p8 = scmp.eq.s32.totalorder %s276_s11, 1 }
   0xd   : > { %p308_p10 = scmp.lt.s32.totalorder %s443_s9, 2  ;;  %s87_s20 = sand.u32 1, %s439_s8  }
   0xe   : > { %p512_p11 = por %p61_p7, %p31_p0  ;;  %p516_p12 = por %p67_p8, %p37_p3 }
   0xf   : > { %s293_s21 = sshll.u32 %s443_s9, 10  ;;  %s279_s22 = sshll.u32 %s87_s20, 6 }
  0x10   : > { %s633_s18 = scalar_select %p512_p11, 1, 0 }
  0x11   : > { %s634_s19 = scalar_select %p516_p12, 1, 0 }
  0x12   : > { %s525_s25 = scalar_lea.hbm %s628_s0, %s293_s21  ;;  %s91_s26 = scalar_lea.vmem [#allocation2], %s279_s22 }
  0x13   : > { %s99_s27 = sshll.u32 %s91_s26, 4  ;;  %p529_p13 = pnand %p308_p10, %p501_p5  ;;  %s533_s27 = int_to_ptr.vmem [resolvable:$true] %s99_s27 }
  0x14   : > { %s535_s29 = scalar_lea.sflag [#allocation3], %s87_s20  ;;  %s347_s30 = scalar_lea.hbm %s525_s25, 1024 }
  0x15   : > { %p348_p0 = scmp.ne.s32.totalorder %s525_s25, %s347_s30  ;;  %p349_p1 = pneg %p529_p13 }
  0x16   : > { %s352_s4 = scalar_lea.hbm %s628_s0, 2048  ;;  %p353_p4 = scmp.lt.u32.totalorder %s525_s25, %s628_s0 }
  0x17   : > { %p350_p2 = pnand %p349_p1, %p348_p0  ;;  %p354_p5 = scmp.lt.u32.totalorder %s352_s4, %s347_s30 }
  0x18   : > { %p356_p8 = scmp.lt.u32.totalorder %s347_s30, %s525_s25 }
  0x19   : > { %p351_p3 = pneg %p350_p2  ;;  %p355_p7 = por %p354_p5, %p353_p4 }
  0x1b   : > { %p357_p10 = por %p356_p8, %p355_p7 }
  0x1d   : > { %p358_p9 = pnand %p357_p10, %p351_p3 }
  0x1f   : > { %361 = shalt.err (!%p358_p9)
}
  0x20   : > { %s362_s13 = scalar_lea.vmem %s533_s27, 1024  ;;  %s445_s14 = smov [#allocation2]  }
  0x21   : > { %p363_p0 = scmp.ne.s32.totalorder %s533_s27, %s362_s13  ;;  %s367_s16 = sshll.u32 %s445_s14, 4  ;;  %s368_s16 = int_to_ptr.vmem [resolvable:$false] %s367_s16 }
  0x22   : > { %s369_s20 = scalar_lea.vmem %s368_s16, 2048  ;;  %p370_p11 = scmp.lt.s32.totalorder %s533_s27, %s368_s16 }
  0x23   : > { %p365_p2 = pnand %p363_p0, %p349_p1  ;;  %p371_p4 = scmp.lt.s32.totalorder %s369_s20, %s362_s13 }
  0x25   : > { %p366_p12 = pneg %p365_p2  ;;  %p372_p5 = por %p371_p4, %p370_p11 }
  0x27   : > { %p373_p7 = pnand %p372_p5, %p366_p12 }
  0x29   : > { %376 = shalt.err (!%p373_p7)
}
  0x2a   : > { %s446_s21 = smov 128   ;;  %s447_s22 = smov 8  }
  0x2b   : > { %303 = dma.hbm_to_vmem [thread:$0]  (!%p529_p13), %s525_s25, 1024, %s533_s27, %s535_s29, %s446_s21, %s446_s21, %s447_s22  }
  0x2c   : > { %p283_p9 = scmp.ge.s32.totalorder %s443_s9, 1  ;;  %p107_p1 = scmp.lt.s32.totalorder %s443_s9, 3 }
  0x2e   : > { %p108_p3 = pnand %p283_p9, %p107_p1 }
  0x2f   : > { %s566_s23 = sand.u32 (!%p108_p3), 1, %s435_s7  }
  0x30   : > { %111 = sbr.rel (%p108_p3) target bundleno = 200 (0xc8), region = 24  ;;  %s284_s24 = sshll.u32 (!%p108_p3), %s566_s23, 6 }
  0x31   : > { %s114_s26 = scalar_lea.sflag (!%p108_p3), [#allocation3], %s566_s23  ;;  %s117_s30 = scalar_lea.vmem (!%p108_p3), [#allocation2], %s284_s24 }
  0x37   : > { %422 = dma.done.wait (%p505_p6), %s114_s26, 1024  }
  0x38   : > { %424 = vsyncadd (%p505_p6), %s114_s26, 4294966272  ;;  %v140_v0 = vld [vmem:[%s117_s30 + $0x11] sm:$0xff]  ;;  %v138_v1 = vld [vmem:[%s117_s30 + $0x1] sm:$0xff]  ;;  %s448_s25 = smov 127   ;;  %vm178_vm0 = vcmask 105472   ;;  %s135_s17 = scalar_lea.vmem [#allocation5], %s284_s24 }
  0x39   : > { %158 = vrot.lane.b32.xlu1 %v140_v0, %s448_s25  ;;  %154 = vrot.lane.b32.xlu0 %v138_v1, %s448_s25  ;;  %v141_v2 = vld [vmem:[%s117_s30 + $0x19] sm:$0x1f]  ;;  %v139_v3 = vld [vmem:[%s117_s30 + $0x9] sm:$0x1f]  ;;  %vm180_vm1 = vcmask 102400   ;;  %s203_s27 = sshll.u32 %s135_s17, 4  ;;  %s577_s27 = int_to_ptr.vmem [resolvable:$true] %s203_s27 }
  0x3a   : > { %v143_v4 = vld [vmem:[%s117_s30 + $0x29] sm:$0x1f]  ;;  %v142_v5 = vld [vmem:[%s117_s30 + $0x21] sm:$0xff]  ;;  %v145_v6 = vld [vmem:[%s117_s30 + $0x39] sm:$0x1f]  ;;  %s295_s28 = sshll.u32 %s483_s10, 10 }
  0x3b   : > { %v144_v7 = vld [vmem:[%s117_s30 + $0x31] sm:$0xff]  ;;  %s583_s3 = scalar_lea.hbm %s629_s1, %s295_s28  ;;  %s189_s10 = scalar_lea.sflag [#allocation4], %s566_s23 }
  0x3c   : > { %s377_s4 = scalar_lea.vmem %s577_s27, 1024  ;;  %p636_p11 = scmp.ne.s32.totalorder %s633_s18, 0 }
  0x3d   : > { %160 = vrot.lane.b32.xlu1 %v141_v2, %s448_s25  ;;  %156 = vrot.lane.b32.xlu0 %v139_v3, %s448_s25  ;;  %p378_p6 = scmp.ne.s32.totalorder %s577_s27, %s377_s4  ;;  %s449_s5 = smov [#allocation5]  }
  0x3e   : > { %s381_s11 = sshll.u32 %s449_s5, 4  ;;  %s382_s11 = int_to_ptr.vmem [resolvable:$false] %s381_s11 }
  0x3f   : > { %p379_p12 = pnand %p378_p6, %p636_p11  ;;  %s383_s13 = scalar_lea.vmem %s382_s11, 2048 }
  0x40   : > { %p384_p8 = scmp.lt.s32.totalorder %s577_s27, %s382_s11  ;;  %p385_p10 = scmp.lt.s32.totalorder %s383_s13, %s377_s4 }
  0x41   : > { %164 = vrot.lane.b32.xlu1 %v143_v4, %s448_s25  ;;  %162 = vrot.lane.b32.xlu0 %v142_v5, %s448_s25  ;;  %p380_p13 = pneg %p379_p12 }
  0x42   : > { %p386_p0 = por %p385_p10, %p384_p8 }
  0x44   : > { %p387_p2 = pnand %p386_p0, %p380_p13 }
  0x45   : > { %168 = vrot.lane.b32.xlu1 %v145_v6, %s448_s25  ;;  %166 = vrot.lane.b32.xlu0 %v144_v7, %s448_s25 }
  0xab   : > { %v159_v8 = vpop.permute.xlu1 %158  ;;  %v155_v9 = vpop.permute.xlu0 %154 }
  0xac   : > { %182 = vst.msk [vmem:[%s135_s17 + $0x10] sm:$0xff] %vm178_vm0, %v159_v8  ;;  %179 = vst.msk [vmem:[%s135_s17] sm:$0xff] %vm178_vm0, %v155_v9 }
  0xaf   : > { %v161_v10 = vpop.permute.xlu1 %160  ;;  %v157_v11 = vpop.permute.xlu0 %156 }
  0xb0   : > { %183 = vst.msk [vmem:[%s135_s17 + $0x18] sm:$0x1f] %vm180_vm1, %v161_v10  ;;  %181 = vst.msk [vmem:[%s135_s17 + $0x8] sm:$0x1f] %vm180_vm1, %v157_v11 }
  0xb3   : > { %v165_v12 = vpop.permute.xlu1 %164  ;;  %v163_v13 = vpop.permute.xlu0 %162 }
  0xb4   : > { %185 = vst.msk [vmem:[%s135_s17 + $0x28] sm:$0x1f] %vm180_vm1, %v165_v12 }
  0xb5   : > { %184 = vst.msk [vmem:[%s135_s17 + $0x20] sm:$0xff] %vm178_vm0, %v163_v13 }
  0xb7   : > { %v169_v14 = vpop.permute.xlu1 %168  ;;  %v167_v15 = vpop.permute.xlu0 %166 }
  0xb8   : > { %187 = vst.msk [vmem:[%s135_s17 + $0x38] sm:$0x1f] %vm180_vm1, %v169_v14 }
  0xb9   : > { %186 = vst.msk [vmem:[%s135_s17 + $0x30] sm:$0xff] %vm178_vm0, %v167_v15 }
  0xba   : > { %390 = shalt.err (!%p387_p2)
}
  0xbb   : > { %s391_s14 = scalar_lea.hbm %s583_s3, 1024  ;;  %s395_s21 = scalar_lea.hbm %s629_s1, 2048 }
  0xbc   : > { %p392_p4 = scmp.ne.s32.totalorder %s583_s3, %s391_s14  ;;  %p396_p9 = scmp.lt.u32.totalorder %s583_s3, %s629_s1 }
  0xbd   : > { %p397_p1 = scmp.lt.u32.totalorder %s395_s21, %s391_s14  ;;  %p399_p6 = scmp.lt.u32.totalorder %s391_s14, %s583_s3 }
  0xbe   : > { %p393_p5 = pnand %p392_p4, %p636_p11 }
  0xbf   : > { %p398_p3 = por %p397_p1, %p396_p9 }
  0xc0   : > { %p394_p7 = pneg %p393_p5 }
  0xc1   : > { %p400_p12 = por %p399_p6, %p398_p3 }
  0xc3   : > { %p401_p13 = pnand %p400_p12, %p394_p7 }
  0xc5   : > { %404 = shalt.err (!%p401_p13)
}
  0xc6   : > { %s450_s26 = smov 128   ;;  %s451_s30 = smov 8  }
  0xc7   : > { %298 = dma.vmem_to_hbm [thread:$0]  (%p636_p11), %s577_s27, 1024, %s583_s3, %s189_s10, %s450_s26, %s450_s26, %s451_s30  }
  0xc8 PF: > { %s218_s25 = sand.u32 1, %s431_s6   ;;  %p637_p8 = scmp.ne.s32.totalorder %s634_s19, 0 }
  0xc9   : > { %p638_p10 = scmp.ge.s32.totalorder %s443_s9, 2  ;;  %s219_s17 = scalar_lea.sflag [#allocation4], %s218_s25 }
  0xcb   : > { %p305_p0 = pnand %p638_p10, %p637_p8 }
  0xcd   : > { %426 = dma.done.wait (!%p305_p0), %s219_s17, 1024  }
  0xce   : > { %428 = vsyncadd (!%p305_p0), %s219_s17, 4294966272  ;;  %p14_p2 = scmp.ge.s32.totalorder %s487_s12, 4   ;;  %s639_s6 = smov %s435_s7 }
  0xcf   : > { %s640_s7 = smov %s439_s8  ;;  %s641_s8 = smov %s499_s15 }
  0xd0   : > { %s642_s9 = smov %s487_s12  ;;  %16 = sbr.rel (!%p14_p2) target bundleno = 5 (0x5), region = 69 }
  0xd7   :  { %224 = vsyncpa [#allocation3], 1 }
  0xd8   :  { %226 = vsyncpa [#allocation3 + $0x1], 1 }
  0xd9   :  { %227 = vsyncpa [#allocation4], 1 }
  0xda   :  { %229 = vsyncpa [#allocation4 + $0x1], 1 }

</bundles_post_ra>
